<compile_context>
chip_gen: v5e
topology: v5e:2x2
jax: 0.10.0
libtpu: 0.0.40
codegen_flags: <defaults>
</compile_context>

<pallas_src>
import jax
import jax.numpy as jnp
from jax import lax
from jax.experimental import pallas as pl
from jax.experimental.pallas import tpu as pltpu


_VMEM_LIMIT_BYTES = 48 * 1024 * 1024   # <= ~48 MiB: safe on v5e/v6e/v7x


def _round_up(n, m):
    return ((n + m - 1) // m) * m


def _const_spec(shape):
    """BlockSpec for a grid-invariant (weight-like) operand: single buffer."""
    return pl.BlockSpec(shape, lambda i: (0,) * len(shape),
                        pipeline_mode=pl.Buffered(1))


# --------------------------------------------------------------------------
# Kernels
# --------------------------------------------------------------------------

def _apply_kernel(x_ref, w1_ref, s_ref, t_ref, w2_ref, b2_ref, o_ref):
    """Fused (x @ W1) * scale + shift -> ReLU -> @ W2 + b2 on one row tile."""
    # Linear 1 (MXU, bf16 operands, f32 accumulation).  b1 is pre-folded /
    # cancelled, so no bias add here.
    h = jnp.dot(x_ref[...], w1_ref[...], preferred_element_type=jnp.float32)
    # BatchNorm affine collapsed to one FMA (f32), then ReLU (VPU).
    h = h * s_ref[...] + t_ref[...]
    a = jnp.maximum(h, 0.0).astype(jnp.bfloat16)
    # Linear 2 (MXU) + bias, lane-dense f32 store.
    y = jnp.dot(a, w2_ref[...], preferred_element_type=jnp.float32)
    o_ref[...] = (y + b2_ref[...]).astype(o_ref.dtype)


def _stats_kernel(x_ref, w1_ref, sum_ref, sq_ref):
    """Accumulate per-feature sum and sum-of-squares of h = x @ W1 (no b1)."""
    @pl.when(pl.program_id(0) == 0)
    def _init():
        sum_ref[...] = jnp.zeros_like(sum_ref)
        sq_ref[...] = jnp.zeros_like(sq_ref)

    h = jnp.dot(x_ref[...], w1_ref[...], preferred_element_type=jnp.float32)
    sum_ref[...] += jnp.sum(h, axis=0, keepdims=True)
    sq_ref[...] += jnp.sum(h * h, axis=0, keepdims=True)


# --------------------------------------------------------------------------
# pallas_call wrappers
# --------------------------------------------------------------------------

def _apply_call(xp, w1, scale, shift, w2, b2, *, tb):
    Bp, Din = xp.shape
    H = w1.shape[1]
    Dout = w2.shape[1]
    nb = Bp // tb
    return pl.pallas_call(
        _apply_kernel,
        out_shape=jax.ShapeDtypeStruct((Bp, Dout), jnp.float32),
        grid=(nb,),
        in_specs=[
            pl.BlockSpec((tb, Din), lambda i: (i, 0)),   # x row tiles
            _const_spec((Din, H)),                       # W1 (bf16, resident)
            _const_spec((1, H)),                         # scale (f32)
            _const_spec((1, H)),                         # shift (f32)
            _const_spec((H, Dout)),                      # W2 (bf16, resident)
            _const_spec((1, Dout)),                      # b2 (f32)
        ],
        out_specs=pl.BlockSpec((tb, Dout), lambda i: (i, 0)),
        compiler_params=pltpu.CompilerParams(
            dimension_semantics=("parallel",),
            vmem_limit_bytes=_VMEM_LIMIT_BYTES),
    )(xp, w1, scale, shift, w2, b2)


def _stats_call(xp, w1, *, tb):
    Bp, Din = xp.shape
    H = w1.shape[1]
    nb = Bp // tb
    return pl.pallas_call(
        _stats_kernel,
        out_shape=(jax.ShapeDtypeStruct((1, H), jnp.float32),
                   jax.ShapeDtypeStruct((1, H), jnp.float32)),
        grid=(nb,),
        in_specs=[
            pl.BlockSpec((tb, Din), lambda i: (i, 0)),   # x row tiles
            _const_spec((Din, H)),                       # W1 (bf16, resident)
        ],
        out_specs=(pl.BlockSpec((1, H), lambda i: (0, 0)),   # running sum
                   pl.BlockSpec((1, H), lambda i: (0, 0))),  # running sum-of-squares
        compiler_params=pltpu.CompilerParams(
            dimension_semantics=("arbitrary",),          # reduction axis
            vmem_limit_bytes=_VMEM_LIMIT_BYTES),
    )(xp, w1)


# --------------------------------------------------------------------------
# Forward (matches ProjectionHead.forward)
# --------------------------------------------------------------------------

def projection_head_forward(params, x, *, training=True, eps=1e-5):
    """x: (B, Din) f32 -> (B, Dout) f32.

    Weights are stored (in, out), i.e. torch Linear weight transposed.
    """
    B, Din = x.shape
    H = params["w1"].shape[1]
    Dout = params["w2"].shape[1]

    w1 = params["w1"].astype(jnp.bfloat16)
    w2 = params["w2"].astype(jnp.bfloat16)

    # Row tiling: multiples of 8, capped at 256 rows; pad the remainder with
    # zero rows (independent rows in eval; zero rows contribute exactly 0 to
    # the training stats because b1 is not added inside the kernel).
    tb = min(256, _round_up(B, 8))
    Bp = _round_up(B, tb)
    xp = x if Bp == B else jnp.pad(x, ((0, Bp - B), (0, 0)))
    xp = xp.astype(jnp.bfloat16)

    if training:
        # TODO(synk): PyTorch BatchNorm1d also updates running_mean/running_var
        # as a training-mode side effect; only the forward activations are
        # reproduced here.
        h_sum, h_sq = _stats_call(xp, w1, tb=tb)
        mean = h_sum[0] / B
        var = jnp.maximum(h_sq[0] / B - mean * mean, 0.0)   # biased variance
        inv = lax.rsqrt(var + eps)
        scale = params["gamma"] * inv
        shift = params["beta"] - mean * scale
        # b1 cancels exactly under train-mode batch normalization.
    else:
        inv = lax.rsqrt(params["running_var"] + eps)
        scale = params["gamma"] * inv
        shift = params["beta"] + (params["b1"] - params["running_mean"]) * scale

    out = _apply_call(
        xp, w1,
        scale.reshape(1, H).astype(jnp.float32),
        shift.reshape(1, H).astype(jnp.float32),
        w2, params["b2"].reshape(1, Dout).astype(jnp.float32),
        tb=tb)
    return out[:B]


# --------------------------------------------------------------------------
# Pure-JAX reference (torch semantics, f32 highest precision)
# --------------------------------------------------------------------------

def projection_head_reference(params, x, *, training=True, eps=1e-5):
    h = jnp.dot(x, params["w1"], precision=lax.Precision.HIGHEST) + params["b1"]
    if training:
        mean = jnp.mean(h, axis=0, keepdims=True)
        var = jnp.mean(jnp.square(h - mean), axis=0, keepdims=True)
    else:
        mean = params["running_mean"][None, :]
        var = params["running_var"][None, :]
    h = (h - mean) / jnp.sqrt(var + eps) * params["gamma"] + params["beta"]
    h = jnp.maximum(h, 0.0)
    return jnp.dot(h, params["w2"], precision=lax.Precision.HIGHEST) + params["b2"]


# --------------------------------------------------------------------------

if __name__ == "__main__":
    key = jax.random.PRNGKey(0)
    kx, k1, kb1, kg, kbe, km, kv, k2, kb2 = jax.random.split(key, 9)

    # Small, (8,128)-aligned shapes consistent with the module
    # (constructor dims are free; output_dim=128 matches the default).
    B, DIN, HID, DOUT = 16, 256, 256, 128

    x = jax.random.normal(kx, (B, DIN), jnp.float32)
    params = {
        "w1": jax.random.normal(k1, (DIN, HID), jnp.float32) / (DIN ** 0.5),
        "b1": 0.1 * jax.random.normal(kb1, (HID,), jnp.float32),
        "gamma": 1.0 + 0.1 * jax.random.normal(kg, (HID,), jnp.float32),
        "beta": 0.1 * jax.random.normal(kbe, (HID,), jnp.float32),
        "running_mean": 0.1 * jax.random.normal(km, (HID,), jnp.float32),
        "running_var": jnp.abs(1.0 + 0.1 * jax.random.normal(kv, (HID,), jnp.float32)),
        "w2": jax.random.normal(k2, (HID, DOUT), jnp.float32) / (HID ** 0.5),
        "b2": 0.1 * jax.random.normal(kb2, (DOUT,), jnp.float32),
    }

    for training in (True, False):
        out = projection_head_forward(params, x, training=training)
        out = jax.block_until_ready(out)
        ref = projection_head_reference(params, x, training=training)
        assert out.shape == (B, DOUT), out.shape
        assert out.dtype == jnp.float32, out.dtype
        max_err = float(jnp.max(jnp.abs(out - ref)))
        assert jnp.allclose(out, ref, atol=3e-2, rtol=3e-2), ("max abs err:", max_err)

    print("KERNEL_OK")
</pallas_src>

<mosaic_0001>
module attributes {stable_mosaic.version = 11 : i64} {
  func.func @_stats_kernel(%arg0: i32, %arg1: memref<16x256xbf16, #tpu.memory_space<vmem>>, %arg2: memref<256x256xbf16, #tpu.memory_space<vmem>>, %arg3: memref<1x256xf32, #tpu.memory_space<vmem>>, %arg4: memref<1x256xf32, #tpu.memory_space<vmem>>) attributes {dimension_semantics = [#tpu.dimension_semantics<arbitrary>], iteration_bounds = array<i64: 1>, scalar_prefetch = 0 : i64, scratch_operands = 0 : i64, tpu.core_type = #tpu.core_type<tc>, window_params = [{transform_indices = @transform_0, window_bounds = array<i64: 16, 256>}, {pipeline_mode = #tpu.pipeline_mode<synchronous>, transform_indices = @transform_1, window_bounds = array<i64: 256, 256>}, {pipeline_mode = #tpu.pipeline_mode<synchronous>, transform_indices = @transform_2, window_bounds = array<i64: 1, 256>}, {pipeline_mode = #tpu.pipeline_mode<synchronous>, transform_indices = @transform_3, window_bounds = array<i64: 1, 256>}]} {
    %c0_i32 = arith.constant 0 : i32
    %0 = arith.cmpi eq, %arg0, %c0_i32 : i32
    %1 = arith.extui %0 : i1 to i32
    %c0_i32_0 = arith.constant 0 : i32
    %2 = arith.cmpi ne, %1, %c0_i32_0 : i32
    scf.if %2 {
      %cst_14 = arith.constant 0.000000e+00 : f32
      %17 = vector.broadcast %cst_14 : f32 to vector<1x256xf32>
      %c0_15 = arith.constant 0 : index
      %c0_16 = arith.constant 0 : index
      %18 = vector.load %arg3[%c0_15, %c0_16] : memref<1x256xf32, #tpu.memory_space<vmem>>, vector<1x256xf32>
      tpu.vector_store %arg3[%c0_15, %c0_16], %17 {strides = array<i32>} : memref<1x256xf32, #tpu.memory_space<vmem>>, vector<1x256xf32>,
      %cst_17 = arith.constant 0.000000e+00 : f32
      %19 = vector.broadcast %cst_17 : f32 to vector<1x256xf32>
      %c0_18 = arith.constant 0 : index
      %c0_19 = arith.constant 0 : index
      %20 = vector.load %arg4[%c0_18, %c0_19] : memref<1x256xf32, #tpu.memory_space<vmem>>, vector<1x256xf32>
      tpu.vector_store %arg4[%c0_18, %c0_19], %19 {strides = array<i32>} : memref<1x256xf32, #tpu.memory_space<vmem>>, vector<1x256xf32>,
    } else {
    }
    %c0 = arith.constant 0 : index
    %c0_1 = arith.constant 0 : index
    %3 = vector.load %arg1[%c0, %c0_1] : memref<16x256xbf16, #tpu.memory_space<vmem>>, vector<16x256xbf16>
    %c0_2 = arith.constant 0 : index
    %c0_3 = arith.constant 0 : index
    %4 = vector.load %arg2[%c0_2, %c0_3] : memref<256x256xbf16, #tpu.memory_space<vmem>>, vector<256x256xbf16>
    %cst = arith.constant dense<0.000000e+00> : vector<16x256xf32>
    %5 = tpu.matmul %3, %4, %cst {dimension_numbers = #tpu.dot_dimension_numbers<[1], [0], [0], [1], [0, 0, 1, 1], [], []>} : vector<16x256xbf16>, vector<256x256xbf16>, vector<16x256xf32> -> vector<16x256xf32>
    %c0_4 = arith.constant 0 : index
    %c0_5 = arith.constant 0 : index
    %6 = vector.load %arg3[%c0_4, %c0_5] : memref<1x256xf32, #tpu.memory_space<vmem>>, vector<1x256xf32>
    %cst_6 = arith.constant dense<0.000000e+00> : vector<256xf32>
    %7 = vector.multi_reduction <add>, %5, %cst_6 [0] : vector<16x256xf32> to vector<256xf32>
    %8 = vector.shape_cast %7 : vector<256xf32> to vector<1x256xf32>
    %9 = arith.addf %6, %8 : vector<1x256xf32>
    %c0_7 = arith.constant 0 : index
    %c0_8 = arith.constant 0 : index
    %10 = vector.load %arg3[%c0_7, %c0_8] : memref<1x256xf32, #tpu.memory_space<vmem>>, vector<1x256xf32>
    tpu.vector_store %arg3[%c0_7, %c0_8], %9 {strides = array<i32>} : memref<1x256xf32, #tpu.memory_space<vmem>>, vector<1x256xf32>,
    %c0_9 = arith.constant 0 : index
    %c0_10 = arith.constant 0 : index
    %11 = vector.load %arg4[%c0_9, %c0_10] : memref<1x256xf32, #tpu.memory_space<vmem>>, vector<1x256xf32>
    %12 = arith.mulf %5, %5 : vector<16x256xf32>
    %cst_11 = arith.constant dense<0.000000e+00> : vector<256xf32>
    %13 = vector.multi_reduction <add>, %12, %cst_11 [0] : vector<16x256xf32> to vector<256xf32>
    %14 = vector.shape_cast %13 : vector<256xf32> to vector<1x256xf32>
    %15 = arith.addf %11, %14 : vector<1x256xf32>
    %c0_12 = arith.constant 0 : index
    %c0_13 = arith.constant 0 : index
    %16 = vector.load %arg4[%c0_12, %c0_13] : memref<1x256xf32, #tpu.memory_space<vmem>>, vector<1x256xf32>
    tpu.vector_store %arg4[%c0_12, %c0_13], %15 {strides = array<i32>} : memref<1x256xf32, #tpu.memory_space<vmem>>, vector<1x256xf32>,
    return
  }
  func.func @transform_0(%arg0: i32) -> (i32, i32) {
    %c0_i32 = arith.constant 0 : i32
    %c0_i32_0 = arith.constant 0 : i32
    return %arg0, %c0_i32 : i32, i32
  }
  func.func @transform_1(%arg0: i32) -> (i32, i32) {
    %c0_i32 = arith.constant 0 : i32
    %c0_i32_0 = arith.constant 0 : i32
    %c0_i32_1 = arith.constant 0 : i32
    return %c0_i32, %c0_i32_0 : i32, i32
  }
  func.func @transform_2(%arg0: i32) -> (i32, i32) {
    %c0_i32 = arith.constant 0 : i32
    %c0_i32_0 = arith.constant 0 : i32
    %c0_i32_1 = arith.constant 0 : i32
    return %c0_i32, %c0_i32_0 : i32, i32
  }
  func.func @transform_3(%arg0: i32) -> (i32, i32) {
    %c0_i32 = arith.constant 0 : i32
    %c0_i32_0 = arith.constant 0 : i32
    %c0_i32_1 = arith.constant 0 : i32
    return %c0_i32, %c0_i32_0 : i32, i32
  }
}

</mosaic_0001>

<bundles_post_ra>
// kernel: tpu_custom_call.1
= control target key start
LH: loop header
LB: loop body
LE: loop exit
PB: predicated region body
PF: predicated region fallthrough
CT: control target
= control target key end

     0   :  { %9 = vsyncpa [#allocation3], 0  ;;  %s738_s0 = inlined_call_operand.hbm [shape: bf16[16,256], index: 0, kind: input, shape index: {}]   ;;  %s739_s1 = inlined_call_operand.hbm [shape: bf16[256,256], index: 1, kind: input, shape index: {}]   ;;  %s740_s2 = inlined_call_operand.hbm [shape: f32[1,256], index: 2, kind: output, shape index: {0}]   ;;  %s741_s3 = inlined_call_operand.hbm [shape: f32[1,256], index: 3, kind: output, shape index: {1}]  }
   0x1   :  { %10 = vsyncpa [#allocation6], 0 }
   0x2   :  { %11 = vsyncpa [#allocation4], 0 }
   0x3   :  { %12 = vsyncpa [#allocation9], 0  ;;  %s17_s14 = sshll.u32 %s738_s0, 4  ;;  %s685_s15 = smov [#allocation2]   ;;  %s18_s14 = int_to_ptr.hbm [resolvable:$true] %s17_s14 }
   0x4   :  { %s19_s16 = sshll.u32 %s685_s15, 4  ;;  %s30_s19 = sshll.u32 %s739_s1, 4  ;;  %s20_s16 = int_to_ptr.vmem [resolvable:$true] %s19_s16  ;;  %s31_s19 = int_to_ptr.hbm [resolvable:$true] %s30_s19 }
   0x5   :  { %s686_s20 = smov 128   ;;  %s687_s21 = smov 8  }
   0x6   :  { %25 = dma.hbm_to_vmem [thread:$0]  %s18_s14, 256, %s20_s16, [#allocation3], %s686_s20, %s686_s20, %s687_s21  }
   0x7   :  { %s688_s22 = smov [#allocation5]  }
   0x8   :  { %s32_s23 = sshll.u32 %s688_s22, 4  ;;  %s33_s23 = int_to_ptr.vmem [resolvable:$true] %s32_s23 }
   0x9   :  { %38 = dma.hbm_to_vmem [thread:$0]  %s31_s19, 4096, %s33_s23, [#allocation6], %s686_s20, %s686_s20, %s687_s21  }
   0xa   :  { %677 = dma.done.wait [#allocation3], 256  }
   0xb   :  { %678 = vsyncadd [#allocation3], 4294967040 }
   0xc   :  { %679 = dma.done.wait [#allocation6], 4096  }
   0xd   :  { %680 = vsyncadd [#allocation6], 4294963200  ;;  %v470_v0 = vld [vmem:[#allocation5 + $0x70] sm:$0xf]  ;;  %v557_v1 = vld [vmem:[#allocation5 + $0x74] sm:$0xf0] }
   0xe   :  { %v534_v2 = vld [vmem:[#allocation5 + $0xf0] sm:$0xf]  ;;  %v471_v3 = vor.u32 %v557_v1, %v470_v0  ;;  %v573_v4 = vld [vmem:[#allocation5 + $0xf4] sm:$0xf0]  ;;  %v556_v5 = vld [vmem:[#allocation5 + $0x74] sm:$0xf] }
   0xf   :  { %v472_v6 = vld [vmem:[#allocation5 + $0x78] sm:$0xf0]  ;;  %v535_v7 = vor.u32 %v573_v4, %v534_v2  ;;  %v572_v9 = vld [vmem:[#allocation5 + $0xf4] sm:$0xf]  ;;  %v462_v11 = vld [vmem:[#allocation5 + $0x60] sm:$0xf] }
  0x10   :  { %v475_v8 = vor.u32 %v556_v5, %v472_v6  ;;  %v536_v10 = vld [vmem:[#allocation5 + $0xf8] sm:$0xf0]  ;;  %261 = vmatpush.bf16.msra.mxu0 %v471_v3  ;;  %v555_v13 = vld [vmem:[#allocation5 + $0x64] sm:$0xf0]  ;;  %v526_v14 = vld [vmem:[#allocation5 + $0xe0] sm:$0xf] }
  0x11   :  { %v539_v12 = vor.u32 %v572_v9, %v536_v10  ;;  %v571_v15 = vld [vmem:[#allocation5 + $0xe4] sm:$0xf0]  ;;  %275 = vmatpush.bf16.msra.mxu1 %v535_v7  ;;  %v463_v16 = vor.u32 %v555_v13, %v462_v11  ;;  %v554_v18 = vld [vmem:[#allocation5 + $0x64] sm:$0xf]  ;;  %v464_v19 = vld [vmem:[#allocation5 + $0x68] sm:$0xf0] }
  0x12   :  { %289 = vmatpush.bf16.msra.mxu2 %v475_v8  ;;  %v527_v17 = vor.u32 %v571_v15, %v526_v14  ;;  %v570_v20 = vld [vmem:[#allocation5 + $0xe4] sm:$0xf]  ;;  %v467_v21 = vor.u32 %v554_v18, %v464_v19  ;;  %v528_v22 = vld [vmem:[#allocation5 + $0xe8] sm:$0xf0]  ;;  %v454_v23 = vld [vmem:[#allocation5 + $0x50] sm:$0xf] }
  0x13   :  { %303 = vmatpush.bf16.msra.mxu3 %v539_v12  ;;  %v553_v24 = vld [vmem:[#allocation5 + $0x54] sm:$0xf0]  ;;  %v531_v25 = vor.u32 %v570_v20, %v528_v22  ;;  %v518_v26 = vld [vmem:[#allocation5 + $0xd0] sm:$0xf]  ;;  %v552_v28 = vld [vmem:[#allocation5 + $0x54] sm:$0xf] }
  0x14   :  { %v569_v27 = vld [vmem:[#allocation5 + $0xd4] sm:$0xf0]  ;;  %262 = vmatpush.bf16.msra.mxu0 %v463_v16  ;;  %v455_v29 = vor.u32 %v553_v24, %v454_v23  ;;  %v456_v30 = vld [vmem:[#allocation5 + $0x58] sm:$0xf0]  ;;  %v568_v31 = vld [vmem:[#allocation5 + $0xd4] sm:$0xf] }
  0x15   :  { %v520_v32 = vld [vmem:[#allocation5 + $0xd8] sm:$0xf0]  ;;  %276 = vmatpush.bf16.msra.mxu1 %v527_v17  ;;  %v519_v33 = vor.u32 %v569_v27, %v518_v26  ;;  %v459_v34 = vor.u32 %v552_v28, %v456_v30  ;;  %v446_v35 = vld [vmem:[#allocation5 + $0x40] sm:$0xf]  ;;  %v551_v36 = vld [vmem:[#allocation5 + $0x44] sm:$0xf0] }
  0x16   :  { %290 = vmatpush.bf16.msra.mxu2 %v467_v21  ;;  %v510_v37 = vld [vmem:[#allocation5 + $0xc0] sm:$0xf]  ;;  %v523_v38 = vor.u32 %v568_v31, %v520_v32  ;;  %v567_v39 = vld [vmem:[#allocation5 + $0xc4] sm:$0xf0]  ;;  %v550_v40 = vld [vmem:[#allocation5 + $0x44] sm:$0xf]  ;;  %v447_v44 = vor.u32 %v551_v36, %v446_v35 }
  0x17   :  { %304 = vmatpush.bf16.msra.mxu3 %v531_v25  ;;  %v448_v41 = vld [vmem:[#allocation5 + $0x48] sm:$0xf0]  ;;  %v566_v42 = vld [vmem:[#allocation5 + $0xc4] sm:$0xf]  ;;  %v511_v45 = vor.u32 %v567_v39, %v510_v37  ;;  %v438_v47 = vld [vmem:[#allocation5 + $0x30] sm:$0xf] }
  0x18   :  { %v512_v43 = vld [vmem:[#allocation5 + $0xc8] sm:$0xf0]  ;;  %263 = vmatpush.bf16.msra.mxu0 %v455_v29  ;;  %v451_v46 = vor.u32 %v550_v40, %v448_v41  ;;  %v549_v48 = vld [vmem:[#allocation5 + $0x34] sm:$0xf0]  ;;  %v502_v49 = vld [vmem:[#allocation5 + $0xb0] sm:$0xf] }
  0x19   :  { %277 = vmatpush.bf16.msra.mxu1 %v519_v33  ;;  %v515_v50 = vor.u32 %v566_v42, %v512_v43  ;;  %v565_v51 = vld [vmem:[#allocation5 + $0xb4] sm:$0xf0]  ;;  %v548_v52 = vld [vmem:[#allocation5 + $0x34] sm:$0xf]  ;;  %v440_v53 = vld [vmem:[#allocation5 + $0x38] sm:$0xf0]  ;;  %v439_v56 = vor.u32 %v549_v48, %v438_v47 }
  0x1a   :  { %291 = vmatpush.bf16.msra.mxu2 %v459_v34  ;;  %v564_v54 = vld [vmem:[#allocation5 + $0xb4] sm:$0xf]  ;;  %v504_v55 = vld [vmem:[#allocation5 + $0xb8] sm:$0xf0]  ;;  %v503_v57 = vor.u32 %v565_v51, %v502_v49  ;;  %v443_v58 = vor.u32 %v548_v52, %v440_v53  ;;  %v430_v59 = vld [vmem:[#allocation5 + $0x20] sm:$0xf] }
  0x1b   :  { %305 = vmatpush.bf16.msra.mxu3 %v523_v38  ;;  %v547_v60 = vld [vmem:[#allocation5 + $0x24] sm:$0xf0]  ;;  %v494_v61 = vld [vmem:[#allocation5 + $0xa0] sm:$0xf]  ;;  %v507_v62 = vor.u32 %v564_v54, %v504_v55  ;;  %v546_v0 = vld [vmem:[#allocation5 + $0x24] sm:$0xf]  ;;  %v51_v38 = vlaneseq }
  0x1c   :  { %264 = vmatpush.bf16.msra.mxu0 %v447_v44  ;;  %v563_v63 = vld [vmem:[#allocation5 + $0xa4] sm:$0xf0]  ;;  %v432_v1 = vld [vmem:[#allocation5 + $0x28] sm:$0xf0]  ;;  %v562_v2 = vld [vmem:[#allocation5 + $0xa4] sm:$0xf]  ;;  %v431_v4 = vor.u32 %v547_v60, %v430_v59 }
  0x1d   :  { %278 = vmatpush.bf16.msra.mxu1 %v511_v45  ;;  %v496_v3 = vld [vmem:[#allocation5 + $0xa8] sm:$0xf0]  ;;  %v495_v5 = vor.u32 %v563_v63, %v494_v61  ;;  %v435_v6 = vor.u32 %v546_v0, %v432_v1  ;;  %v422_v7 = vld [vmem:[#allocation5 + $0x10] sm:$0xf]  ;;  %v545_v8 = vld [vmem:[#allocation5 + $0x14] sm:$0xf0] }
  0x1e   :  { %292 = vmatpush.bf16.msra.mxu2 %v451_v46  ;;  %v486_v9 = vld [vmem:[#allocation5 + $0x90] sm:$0xf]  ;;  %v499_v10 = vor.u32 %v562_v2, %v496_v3  ;;  %v561_v11 = vld [vmem:[#allocation5 + $0x94] sm:$0xf0]  ;;  %v544_v12 = vld [vmem:[#allocation5 + $0x14] sm:$0xf]  ;;  %v423_v16 = vor.u32 %v545_v8, %v422_v7 }
  0x1f   :  { %306 = vmatpush.bf16.msra.mxu3 %v515_v50  ;;  %v424_v13 = vld [vmem:[#allocation5 + $0x18] sm:$0xf0]  ;;  %v560_v14 = vld [vmem:[#allocation5 + $0x94] sm:$0xf]  ;;  %v487_v17 = vor.u32 %v561_v11, %v486_v9  ;;  %v414_v19 = vld [vmem:[#allocation5] sm:$0xf] }
  0x20   :  { %265 = vmatpush.bf16.msra.mxu0 %v439_v56  ;;  %v488_v15 = vld [vmem:[#allocation5 + $0x98] sm:$0xf0]  ;;  %v427_v18 = vor.u32 %v544_v12, %v424_v13  ;;  %v543_v20 = vld [vmem:[#allocation5 + $0x4] sm:$0xf0]  ;;  %v478_v21 = vld [vmem:[#allocation5 + $0x80] sm:$0xf] }
  0x21   :  { %279 = vmatpush.bf16.msra.mxu1 %v503_v57  ;;  %v491_v22 = vor.u32 %v560_v14, %v488_v15  ;;  %v559_v23 = vld [vmem:[#allocation5 + $0x84] sm:$0xf0]  ;;  %v542_v24 = vld [vmem:[#allocation5 + $0x4] sm:$0xf]  ;;  %v416_v25 = vld [vmem:[#allocation5 + $0x8] sm:$0xf0]  ;;  %v415_v28 = vor.u32 %v543_v20, %v414_v19 }
  0x22   :  { %293 = vmatpush.bf16.msra.mxu2 %v443_v58  ;;  %v558_v26 = vld [vmem:[#allocation5 + $0x84] sm:$0xf]  ;;  %v480_v27 = vld [vmem:[#allocation5 + $0x88] sm:$0xf0]  ;;  %v406_v29 = vld [vmem:[#allocation2] sm:$0xf]  ;;  %v479_v31 = vor.u32 %v559_v23, %v478_v21  ;;  %v419_v32 = vor.u32 %v542_v24, %v416_v25 }
  0x23   :  { %307 = vmatpush.bf16.msra.mxu3 %v507_v62  ;;  %v541_v30 = vld [vmem:[#allocation2 + $0x4] sm:$0xf0]  ;;  %v540_v33 = vld [vmem:[#allocation2 + $0x4] sm:$0xf]  ;;  %v408_v34 = vld [vmem:[#allocation2 + $0x8] sm:$0xf0]  ;;  %v483_v35 = vor.u32 %v558_v26, %v480_v27 }
  0x24   :  { %266 = vmatpush.bf16.msra.mxu0 %v431_v4  ;;  %v407_v36 = vor.u32 %v541_v30, %v406_v29  ;;  %v411_v37 = vor.u32 %v540_v33, %v408_v34  ;;  %vm718_vm0 = vcmp.lt.s32.totalorder %v51_v38, 256  ;;  %v689_v40 = vmov 0.0   ;;  %s690_s0 = smov [#allocation7]   ;;  %s377_s26 = sshll.u32 %s740_s2, 4  ;;  %s378_s26 = int_to_ptr.hbm [resolvable:$true] %s377_s26 }
  0x25   :  { %280 = vmatpush.bf16.msra.mxu1 %v495_v5  ;;  %55 = vst.msk [vmem:[#allocation7] sm:$0x3] %vm718_vm0, %v689_v40  ;;  %vm335_vm1 = vcmask 1040384   ;;  %s375_s1 = sshll.u32 %s690_s0, 4  ;;  %s691_s27 = smov [#allocation8]   ;;  %s376_s1 = int_to_ptr.vmem [resolvable:$true] %s375_s1 }
  0x26   :  { %294 = vmatpush.bf16.msra.mxu2 %v435_v6  ;;  %56 = vst.msk [vmem:[#allocation8] sm:$0x3] %vm718_vm0, %v689_v40  ;;  %s386_s28 = sshll.u32 %s691_s27, 4  ;;  %s388_s4 = sshll.u32 %s741_s3, 4  ;;  %s387_s28 = int_to_ptr.vmem [resolvable:$true] %s386_s28  ;;  %s389_s4 = int_to_ptr.hbm [resolvable:$true] %s388_s4 }
  0x27   :  { %308 = vmatpush.bf16.msra.mxu3 %v499_v10 }
  0x28   :  { %267 = vmatpush.bf16.msra.mxu0 %v423_v16 }
  0x29   :  { %281 = vmatpush.bf16.msra.mxu1 %v487_v17 }
  0x2a   :  { %295 = vmatpush.bf16.msra.mxu2 %v427_v18 }
  0x2b   :  { %309 = vmatpush.bf16.msra.mxu3 %v491_v22 }
  0x2c   :  { %268 = vmatpush.bf16.msra.mxu0 %v415_v28  ;;  %v317_v21 = vld [vmem:[#allocation7] sm:$0x3] }
  0x2d   :  { %282 = vmatpush.bf16.msra.mxu1 %v479_v31  ;;  %v344_v25 = vld [vmem:[#allocation8] sm:$0x3] }
  0x2e   :  { %296 = vmatpush.bf16.msra.mxu2 %v419_v32 }
  0x2f   :  { %310 = vmatpush.bf16.msra.mxu3 %v483_v35  ;;  %269 = vmatmul.bf16.vlgmr.msra.gmra.mxu0 %v407_v36 }
  0x30   :  { %283 = vmatmul.bf16.vlgmr.msra.gmra.mxu1 %v411_v37 }
  0x31   :  { %297 = vmatmul.bf16.vlgmr.msra.gmra.mxu2 %v407_v36 }
  0x32   :  { %311 = vmatmul.bf16.vlgmr.msra.gmra.mxu3 %v411_v37 }
  0xac   :  { %v270_v41 = vpop.f32.mrf.mxu0 }
  0xad   :  { %v284_v42 = vpop.f32.mrf.mxu1 }
  0xae   :  { %v285_v43 = vadd.f32 %v284_v42, %v270_v41 }
  0xb0   :  { %v345_v48 = vmul.f32 %v285_v43, %v285_v43 }
  0xb4   :  { %v298_v44 = vpop.f32.mrf.mxu2  ;;  %v272_v46 = vpop.f32.mrf.mxu0 }
  0xb5   :  { %v312_v45 = vpop.f32.mrf.mxu3  ;;  %v286_v47 = vpop.f32.mrf.mxu1 }
  0xb6   :  { %v287_v49 = vadd.f32 %v286_v47, %v272_v46  ;;  %v313_v54 = vadd.f32 %v312_v45, %v298_v44 }
  0xb8   :  { %v318_v50 = vadd.f32 %v287_v49, %v285_v43  ;;  %v347_v51 = vmul.f32 %v287_v49, %v287_v49  ;;  %v346_v60 = vmul.f32 %v313_v54, %v313_v54 }
  0xba   :  { %v319_v52 = vrot.slane %v318_v50, 4  ;;  %v349_v53 = vadd.f32 %v347_v51, %v345_v48 }
  0xbc   :  { %v300_v55 = vpop.f32.mrf.mxu2  ;;  %v350_v56 = vrot.slane %v349_v53, 4  ;;  %v320_v58 = vadd.f32 %v319_v52, %v318_v50 }
  0xbd   :  { %v314_v57 = vpop.f32.mrf.mxu3 }
  0xbe   :  { %v315_v59 = vadd.f32 %v314_v57, %v300_v55  ;;  %v351_v61 = vadd.f32 %v350_v56, %v349_v53  ;;  %v321_v0 = vrot.slane %v320_v58, 2 }
  0xc0   :  { %v325_v62 = vadd.f32 %v315_v59, %v313_v54  ;;  %v348_v63 = vmul.f32 %v315_v59, %v315_v59  ;;  %v352_v3 = vrot.slane %v351_v61, 2  ;;  %v322_v6 = vadd.f32 %v321_v0, %v320_v58 }
  0xc2   :  { %v326_v1 = vrot.slane %v325_v62, 4  ;;  %v356_v2 = vadd.f32 %v348_v63, %v346_v60  ;;  %v353_v9 = vadd.f32 %v352_v3, %v351_v61  ;;  %v323_v12 = vrot.slane %v322_v6, 1 }
  0xc4   :  { %v327_v4 = vadd.f32 %v326_v1, %v325_v62  ;;  %v357_v5 = vrot.slane %v356_v2, 4  ;;  %v354_v15 = vrot.slane %v353_v9, 1  ;;  %v324_v18 = vadd.f32 %v323_v12, %v322_v6 }
  0xc6   :  { %v328_v7 = vrot.slane %v327_v4, 2  ;;  %v358_v8 = vadd.f32 %v357_v5, %v356_v2  ;;  %v355_v22 = vadd.f32 %v354_v15, %v353_v9 }
  0xc8   :  { %v329_v10 = vadd.f32 %v328_v7, %v327_v4  ;;  %v359_v11 = vrot.slane %v358_v8, 2 }
  0xca   :  { %v330_v13 = vrot.slane %v329_v10, 1  ;;  %v360_v14 = vadd.f32 %v359_v11, %v358_v8 }
  0xcc   :  { %v331_v16 = vadd.f32 %v330_v13, %v329_v10  ;;  %v361_v17 = vrot.slane %v360_v14, 1 }
  0xce   :  { %v334_v19 = vrot.slane %v331_v16, 7  ;;  %v362_v20 = vadd.f32 %v361_v17, %v360_v14 }
  0xd0   :  { %v365_v23 = vrot.slane %v362_v20, 7  ;;  %v336_v24 = vsel %vm335_vm1, %v324_v18, %v334_v19 }
  0xd1   :  { %v338_v26 = vadd.f32 %v336_v24, %v317_v21 }
  0xd2   :  { %v366_v27 = vsel %vm335_vm1, %v355_v22, %v365_v23 }
  0xd3   :  { %343 = vst.msk [vmem:[#allocation7] sm:$0x3] %vm718_vm0, %v338_v26  ;;  %v368_v28 = vadd.f32 %v366_v27, %v344_v25 }
  0xd4   :  { %380 = dma.vmem_to_hbm [thread:$0]  %s376_s1, 32, %s378_s26, [#allocation4]  }
  0xd5   :  { %369 = vst.msk [vmem:[#allocation8] sm:$0x3] %vm718_vm0, %v368_v28 }
  0xd6   :  { %391 = dma.vmem_to_hbm [thread:$0]  %s387_s28, 32, %s389_s4, [#allocation9]  }
  0xd7   :  { %681 = dma.done.wait [#allocation4], 32  }
  0xd8   :  { %682 = vsyncadd [#allocation4], 4294967264 }
  0xd9   :  { %683 = dma.done.wait [#allocation9], 32  }
  0xda   :  { %684 = vsyncadd [#allocation9], 4294967264 }
  0xdb   :  { %400 = vsyncpa [#allocation3], 1 }
  0xdc   :  { %401 = vsyncpa [#allocation6], 1 }
  0xdd   :  { %402 = vsyncpa [#allocation4], 1 }
  0xde   :  { %403 = vsyncpa [#allocation9], 1 }

</bundles_post_ra>
